<compile_context>
chip_gen: v7x
topology: tpu7x:2x2x1
jax: 0.10.0
libtpu: 0.0.40
codegen_flags: <defaults>
</compile_context>

<pallas_src>
import jax
import jax.numpy as jnp
from jax.experimental import pallas as pl
from jax.experimental.pallas import tpu as pltpu

ALPHA = 0.01
GAMMA_POS = 3
GAMMA_NEG = 2
GAMMA_DIFF = GAMMA_POS - GAMMA_NEG  # = 1

_LOG_CLAMP = -100.0  # PyTorch's binary_cross_entropy clamps log terms at -100

_LANES = 128
_MAX_TILE_ROWS = 1024  # 1024x128 f32 = 512 KiB per input block; 2 in x 2 bufs = 2 MiB VMEM


def _focal_partial_kernel(x_ref, t_ref, part_ref):
    """Per-tile partial sums: [pt, pos_unscaled, neg, t], each folded to an (8, 128) slab."""
    x = x_ref[...].astype(jnp.float32)
    t = t_ref[...].astype(jnp.float32)

    # PyTorch F.binary_cross_entropy (probabilities), per-element, log clamped at -100.
    log_x = jnp.maximum(jnp.log(x), _LOG_CLAMP)
    log_1mx = jnp.maximum(jnp.log(1.0 - x), _LOG_CLAMP)
    one_m_t = 1.0 - t
    bce = -(t * log_x + one_m_t * log_1mx)

    pt = jnp.exp(-bce)
    one_m_pt = 1.0 - pt
    omp2 = one_m_pt * one_m_pt
    common = ALPHA * bce

    # Unscaled positive term (global mean(pt)^(-gamma_diff) factor applied in the wrapper).
    pos_un = common * t * omp2 * one_m_pt          # alpha * t * (1-pt)^3 * bce
    neg = common * one_m_t * omp2                  # alpha * (1-t) * (1-pt)^2 * bce

    def fold(v):
        # (TILE_ROWS, 128) -> (TILE_ROWS//8, 8, 128) -> (8, 128): pure vreg adds (VPU).
        return jnp.sum(v.reshape(-1, 8, _LANES), axis=0)

    part_ref[0, 0] = fold(pt)
    part_ref[0, 1] = fold(pos_un)
    part_ref[0, 2] = fold(neg)
    part_ref[0, 3] = fold(t)


def focal_loss2(inputs, targets, *, max_tile_rows=_MAX_TILE_ROWS):
    """FocalLoss2.forward with logits=False, reduce=True.

    Returns (mean(F_loss), sum(F_loss_pos)/sum(targets), sum(F_loss_neg)/sum(1-targets)).
    """
    n_elem = inputs.size
    x_flat = inputs.reshape(-1)
    t_flat = targets.reshape(-1)

    # Tile sizing: at most max_tile_rows rows per block, multiple of 8, >= 8.
    rows_needed = -(-n_elem // _LANES)                       # ceil(n / 128)
    tr = min(max_tile_rows, ((rows_needed + 7) // 8) * 8)
    tr = max(8, (tr // 8) * 8)
    block_elems = tr * _LANES
    n_tiles = -(-n_elem // block_elems)
    padded = n_tiles * block_elems
    n_pad = padded - n_elem

    if n_pad:
        # Pad with x=1, t=1: contributes bce=0, pt=1, pos=neg=0; corrected below.
        x_flat = jnp.concatenate([x_flat, jnp.ones((n_pad,), x_flat.dtype)])
        t_flat = jnp.concatenate([t_flat, jnp.ones((n_pad,), t_flat.dtype)])

    x2d = x_flat.reshape(n_tiles * tr, _LANES)
    t2d = t_flat.reshape(n_tiles * tr, _LANES)

    partials = pl.pallas_call(
        _focal_partial_kernel,
        out_shape=jax.ShapeDtypeStruct((n_tiles, 4, 8, _LANES), jnp.float32),
        grid_spec=pltpu.PrefetchScalarGridSpec(
            num_scalar_prefetch=0,
            grid=(n_tiles,),
            in_specs=[
                pl.BlockSpec((tr, _LANES), lambda i: (i, 0)),
                pl.BlockSpec((tr, _LANES), lambda i: (i, 0)),
            ],
            out_specs=pl.BlockSpec((1, 4, 8, _LANES), lambda i: (i, 0, 0, 0)),
        ),
        compiler_params=pltpu.CompilerParams(
            dimension_semantics=("parallel",),
        ),
    )(x2d, t2d)

    # Tiny epilogue reduction + scalar glue in plain JAX.
    sums = jnp.sum(partials, axis=(0, 2, 3))                 # (4,)
    sum_pt = sums[0] - n_pad                                 # each pad elem added pt = 1
    sum_pos_un = sums[1]
    sum_neg = sums[2]
    sum_t = sums[3] - n_pad                                  # each pad elem added t = 1
    sum_1mt = n_elem - sum_t                                 # sum(1 - t) derived, not summed

    mean_pt = sum_pt / n_elem
    scale = mean_pt ** (-GAMMA_DIFF)                         # torch.mean(pt) ** (-gamma_diff)
    mean_F = (scale * sum_pos_un + sum_neg) / n_elem
    avg_pos = scale * sum_pos_un / sum_t
    avg_neg = sum_neg / sum_1mt
    return mean_F, avg_pos, avg_neg


def _focal_loss2_ref(inputs, targets):
    """Pure-JAX reference mirroring the PyTorch forward exactly."""
    x = inputs.astype(jnp.float32)
    t = targets.astype(jnp.float32)
    log_x = jnp.maximum(jnp.log(x), _LOG_CLAMP)
    log_1mx = jnp.maximum(jnp.log(1.0 - x), _LOG_CLAMP)
    bce = -(t * log_x + (1.0 - t) * log_1mx)
    pt = jnp.exp(-bce)
    f_pos = ALPHA * t * (1.0 - pt) ** GAMMA_POS * bce
    f_pos = jnp.mean(pt) ** (-GAMMA_DIFF) * f_pos
    f_neg = ALPHA * (1.0 - t) * (1.0 - pt) ** GAMMA_NEG * bce
    f = f_pos + f_neg
    return (
        jnp.mean(f),
        jnp.sum(f_pos) / jnp.sum(t),
        jnp.sum(f_neg) / jnp.sum(1.0 - t),
    )


if __name__ == "__main__":
    key = jax.random.PRNGKey(0)
    kx, kt, kx2, kt2 = jax.random.split(key, 4)

    # Main example: NCHW, B*C*H*W = 2048 = 16 rows of 128 lanes (single tile).
    B, C, H, W = 2, 4, 16, 16
    inputs = jax.random.uniform(kx, (B, C, H, W), jnp.float32, minval=0.01, maxval=0.99)
    targets = (jax.random.uniform(kt, (B, C, H, W), jnp.float32) > 0.7).astype(jnp.float32)

    out = focal_loss2(inputs, targets)
    out = jax.block_until_ready(out)
    ref = _focal_loss2_ref(inputs, targets)
    for o, r in zip(out, ref):
        assert jnp.allclose(o, r, rtol=1e-5, atol=1e-6), (o, r)

    # Second example with a non-tile-aligned size to exercise padding + correction.
    B2, C2, H2, W2 = 2, 3, 15, 17  # 1530 elements (not a multiple of 1024)
    inputs2 = jax.random.uniform(kx2, (B2, C2, H2, W2), jnp.float32, minval=0.01, maxval=0.99)
    targets2 = (jax.random.uniform(kt2, (B2, C2, H2, W2), jnp.float32) > 0.7).astype(jnp.float32)

    out2 = focal_loss2(inputs2, targets2)
    out2 = jax.block_until_ready(out2)
    ref2 = _focal_loss2_ref(inputs2, targets2)
    for o, r in zip(out2, ref2):
        assert jnp.allclose(o, r, rtol=1e-5, atol=1e-6), (o, r)

    print("KERNEL_OK")
</pallas_src>

<mosaic_0001>
module attributes {stable_mosaic.version = 11 : i64} {
  func.func @_focal_partial_kernel(%arg0: i32, %arg1: memref<16x128xf32, #tpu.memory_space<vmem>>, %arg2: memref<16x128xf32, #tpu.memory_space<vmem>>, %arg3: memref<1x4x8x128xf32, #tpu.memory_space<vmem>>) attributes {dimension_semantics = [#tpu.dimension_semantics<parallel>], iteration_bounds = array<i64: 1>, scalar_prefetch = 0 : i64, scratch_operands = 0 : i64, tpu.core_type = #tpu.core_type<tc>, window_params = [{transform_indices = @transform_0, window_bounds = array<i64: 16, 128>}, {transform_indices = @transform_1, window_bounds = array<i64: 16, 128>}, {transform_indices = @transform_2, window_bounds = array<i64: 1, 4, 8, 128>}]} {
    %c0 = arith.constant 0 : index
    %c0_0 = arith.constant 0 : index
    %0 = vector.load %arg1[%c0, %c0_0] : memref<16x128xf32, #tpu.memory_space<vmem>>, vector<16x128xf32>
    %c0_1 = arith.constant 0 : index
    %c0_2 = arith.constant 0 : index
    %1 = vector.load %arg2[%c0_1, %c0_2] : memref<16x128xf32, #tpu.memory_space<vmem>>, vector<16x128xf32>
    %2 = math.log %0 : vector<16x128xf32>
    %cst = arith.constant -1.000000e+02 : f32
    %3 = vector.broadcast %cst : f32 to vector<16x128xf32>
    %4 = arith.maximumf %2, %3 : vector<16x128xf32>
    %cst_3 = arith.constant 1.000000e+00 : f32
    %5 = vector.broadcast %cst_3 : f32 to vector<16x128xf32>
    %6 = arith.subf %5, %0 : vector<16x128xf32>
    %7 = math.log %6 : vector<16x128xf32>
    %cst_4 = arith.constant -1.000000e+02 : f32
    %8 = vector.broadcast %cst_4 : f32 to vector<16x128xf32>
    %9 = arith.maximumf %7, %8 : vector<16x128xf32>
    %cst_5 = arith.constant 1.000000e+00 : f32
    %10 = vector.broadcast %cst_5 : f32 to vector<16x128xf32>
    %11 = arith.subf %10, %1 : vector<16x128xf32>
    %12 = arith.mulf %1, %4 : vector<16x128xf32>
    %13 = arith.mulf %11, %9 : vector<16x128xf32>
    %14 = arith.addf %12, %13 : vector<16x128xf32>
    %cst_6 = arith.constant 0.000000e+00 : f32
    %15 = vector.broadcast %cst_6 : f32 to vector<16x128xf32>
    %16 = arith.subf %15, %14 : vector<16x128xf32>
    %cst_7 = arith.constant 0.000000e+00 : f32
    %17 = vector.broadcast %cst_7 : f32 to vector<16x128xf32>
    %18 = arith.subf %17, %16 : vector<16x128xf32>
    %19 = math.exp %18 : vector<16x128xf32>
    %cst_8 = arith.constant 1.000000e+00 : f32
    %20 = vector.broadcast %cst_8 : f32 to vector<16x128xf32>
    %21 = arith.subf %20, %19 : vector<16x128xf32>
    %22 = arith.mulf %21, %21 : vector<16x128xf32>
    %cst_9 = arith.constant 0.00999999977 : f32
    %23 = vector.broadcast %cst_9 : f32 to vector<16x128xf32>
    %24 = arith.mulf %23, %16 : vector<16x128xf32>
    %25 = arith.mulf %24, %1 : vector<16x128xf32>
    %26 = arith.mulf %25, %22 : vector<16x128xf32>
    %27 = arith.mulf %26, %21 : vector<16x128xf32>
    %28 = arith.mulf %24, %11 : vector<16x128xf32>
    %29 = arith.mulf %28, %22 : vector<16x128xf32>
    %30 = vector.shape_cast %19 : vector<16x128xf32> to vector<2x8x128xf32>
    %cst_10 = arith.constant dense<0.000000e+00> : vector<8x128xf32>
    %31 = vector.multi_reduction <add>, %30, %cst_10 [0] : vector<2x8x128xf32> to vector<8x128xf32>
    %c0_11 = arith.constant 0 : index
    %c0_12 = arith.constant 0 : index
    %c0_13 = arith.constant 0 : index
    %c0_14 = arith.constant 0 : index
    %32 = vector.load %arg3[%c0_11, %c0_12, %c0_13, %c0_14] : memref<1x4x8x128xf32, #tpu.memory_space<vmem>>, vector<1x1x8x128xf32>
    %33 = vector.shape_cast %32 : vector<1x1x8x128xf32> to vector<8x128xf32>
    %34 = vector.shape_cast %31 : vector<8x128xf32> to vector<1x1x8x128xf32>
    tpu.vector_store %arg3[%c0_11, %c0_12, %c0_13, %c0_14], %34 {strides = array<i32>} : memref<1x4x8x128xf32, #tpu.memory_space<vmem>>, vector<1x1x8x128xf32>,
    %35 = vector.shape_cast %27 : vector<16x128xf32> to vector<2x8x128xf32>
    %cst_15 = arith.constant dense<0.000000e+00> : vector<8x128xf32>
    %36 = vector.multi_reduction <add>, %35, %cst_15 [0] : vector<2x8x128xf32> to vector<8x128xf32>
    %c0_16 = arith.constant 0 : index
    %c1 = arith.constant 1 : index
    %c0_17 = arith.constant 0 : index
    %c0_18 = arith.constant 0 : index
    %37 = vector.load %arg3[%c0_16, %c1, %c0_17, %c0_18] : memref<1x4x8x128xf32, #tpu.memory_space<vmem>>, vector<1x1x8x128xf32>
    %38 = vector.shape_cast %37 : vector<1x1x8x128xf32> to vector<8x128xf32>
    %39 = vector.shape_cast %36 : vector<8x128xf32> to vector<1x1x8x128xf32>
    tpu.vector_store %arg3[%c0_16, %c1, %c0_17, %c0_18], %39 {strides = array<i32>} : memref<1x4x8x128xf32, #tpu.memory_space<vmem>>, vector<1x1x8x128xf32>,
    %40 = vector.shape_cast %29 : vector<16x128xf32> to vector<2x8x128xf32>
    %cst_19 = arith.constant dense<0.000000e+00> : vector<8x128xf32>
    %41 = vector.multi_reduction <add>, %40, %cst_19 [0] : vector<2x8x128xf32> to vector<8x128xf32>
    %c0_20 = arith.constant 0 : index
    %c2 = arith.constant 2 : index
    %c0_21 = arith.constant 0 : index
    %c0_22 = arith.constant 0 : index
    %42 = vector.load %arg3[%c0_20, %c2, %c0_21, %c0_22] : memref<1x4x8x128xf32, #tpu.memory_space<vmem>>, vector<1x1x8x128xf32>
    %43 = vector.shape_cast %42 : vector<1x1x8x128xf32> to vector<8x128xf32>
    %44 = vector.shape_cast %41 : vector<8x128xf32> to vector<1x1x8x128xf32>
    tpu.vector_store %arg3[%c0_20, %c2, %c0_21, %c0_22], %44 {strides = array<i32>} : memref<1x4x8x128xf32, #tpu.memory_space<vmem>>, vector<1x1x8x128xf32>,
    %45 = vector.shape_cast %1 : vector<16x128xf32> to vector<2x8x128xf32>
    %cst_23 = arith.constant dense<0.000000e+00> : vector<8x128xf32>
    %46 = vector.multi_reduction <add>, %45, %cst_23 [0] : vector<2x8x128xf32> to vector<8x128xf32>
    %c0_24 = arith.constant 0 : index
    %c3 = arith.constant 3 : index
    %c0_25 = arith.constant 0 : index
    %c0_26 = arith.constant 0 : index
    %47 = vector.load %arg3[%c0_24, %c3, %c0_25, %c0_26] : memref<1x4x8x128xf32, #tpu.memory_space<vmem>>, vector<1x1x8x128xf32>
    %48 = vector.shape_cast %47 : vector<1x1x8x128xf32> to vector<8x128xf32>
    %49 = vector.shape_cast %46 : vector<8x128xf32> to vector<1x1x8x128xf32>
    tpu.vector_store %arg3[%c0_24, %c3, %c0_25, %c0_26], %49 {strides = array<i32>} : memref<1x4x8x128xf32, #tpu.memory_space<vmem>>, vector<1x1x8x128xf32>,
    return
  }
  func.func @transform_0(%arg0: i32) -> (i32, i32) {
    %c0_i32 = arith.constant 0 : i32
    %c0_i32_0 = arith.constant 0 : i32
    return %arg0, %c0_i32 : i32, i32
  }
  func.func @transform_1(%arg0: i32) -> (i32, i32) {
    %c0_i32 = arith.constant 0 : i32
    %c0_i32_0 = arith.constant 0 : i32
    return %arg0, %c0_i32 : i32, i32
  }
  func.func @transform_2(%arg0: i32) -> (i32, i32, i32, i32) {
    %c0_i32 = arith.constant 0 : i32
    %c0_i32_0 = arith.constant 0 : i32
    %c0_i32_1 = arith.constant 0 : i32
    %c0_i32_2 = arith.constant 0 : i32
    return %arg0, %c0_i32, %c0_i32_0, %c0_i32_1 : i32, i32, i32, i32
  }
}

</mosaic_0001>

<bundles_post_ra>
// kernel: tpu_custom_call.1
= control target key start
LH: loop header
LB: loop body
LE: loop exit
PB: predicated region body
PF: predicated region fallthrough
CT: control target
= control target key end

     0   :  { %7 = vsyncpa [#allocation3], 0  ;;  %s273_s0 = inlined_call_operand.hbm [shape: f32[16,128], index: 0, kind: input, shape index: {}]   ;;  %s274_s1 = inlined_call_operand.hbm [shape: f32[16,128], index: 1, kind: input, shape index: {}]   ;;  %s275_s2 = inlined_call_operand.hbm [shape: f32[1,4,8,128], index: 2, kind: output, shape index: {}]  }
   0x1   :  { %8 = vsyncpa [#allocation6], 0 }
   0x2   :  { %9 = vsyncpa [#allocation4], 0  ;;  %s208_s9 = smov [#allocation2]   ;;  %s136_s13 = scalar_lea.hbm %s273_s0, 256 }
   0x3   :  { %s15_s10 = sshll.u32 %s208_s9, 4  ;;  %p137_p0 = scmp.ne.s32.totalorder %s273_s0, %s136_s13  ;;  %s16_s10 = int_to_ptr.vmem [resolvable:$true] %s15_s10 }
   0x4   :  { %p140_p1 = scmp.lt.u32.totalorder %s136_s13, %s273_s0 }
   0x6   :  { %p142_p2 = pnand %p140_p1, %p137_p0 }
   0x8   :  { %145 = shalt.err (!%p142_p2)
}
   0x9   :  { %s146_s18 = scalar_lea.vmem %s16_s10, 256  ;;  %p151_p4 = scmp.lt.s32.totalorder %s16_s10, %s16_s10 }
   0xa   :  { %p147_p3 = scmp.ne.s32.totalorder %s16_s10, %s146_s18  ;;  %p152_p5 = scmp.lt.s32.totalorder %s146_s18, %s146_s18 }
   0xc   :  { %p153_p6 = por %p152_p5, %p151_p4 }
   0xe   :  { %p154_p7 = pnand %p153_p6, %p147_p3 }
  0x10   :  { %157 = shalt.err (!%p154_p7)
}
  0x11   :  { %s209_s19 = smov 128   ;;  %s210_s20 = smov 8  }
  0x12   :  { %21 = dma.hbm_to_vmem [thread:$0]  %s273_s0, 256, %s16_s10, [#allocation3], %s209_s19, %s209_s19, %s210_s20  }
  0x13   :  { %s211_s23 = smov [#allocation5]   ;;  %s158_s27 = scalar_lea.hbm %s274_s1, 256 }
  0x14   :  { %s27_s24 = sshll.u32 %s211_s23, 4  ;;  %p159_p8 = scmp.ne.s32.totalorder %s274_s1, %s158_s27  ;;  %s28_s24 = int_to_ptr.vmem [resolvable:$true] %s27_s24 }
  0x15   :  { %p162_p9 = scmp.lt.u32.totalorder %s158_s27, %s274_s1 }
  0x17   :  { %p164_p10 = pnand %p162_p9, %p159_p8 }
  0x19   :  { %167 = shalt.err (!%p164_p10)
}
  0x1a   :  { %s168_s4 = scalar_lea.vmem %s28_s24, 256  ;;  %p173_p12 = scmp.lt.s32.totalorder %s28_s24, %s28_s24 }
  0x1b   :  { %p169_p11 = scmp.ne.s32.totalorder %s28_s24, %s168_s4  ;;  %p174_p13 = scmp.lt.s32.totalorder %s168_s4, %s168_s4 }
  0x1d   :  { %p175_p0 = por %p174_p13, %p173_p12 }
  0x1f   :  { %p176_p1 = pnand %p175_p0, %p169_p11 }
  0x21   :  { %179 = shalt.err (!%p176_p1)
}
  0x22   :  { %33 = dma.hbm_to_vmem [thread:$0]  %s274_s1, 256, %s28_s24, [#allocation6], %s209_s19, %s209_s19, %s210_s20  }
  0x23   :  { %202 = dma.done.wait [#allocation3], 256  }
  0x24   :  { %203 = vsyncadd [#allocation3], 4294967040 }
  0x25   :  { %204 = dma.done.wait [#allocation6], 256  }
  0x26   :  { %205 = vsyncadd [#allocation6], 4294967040  ;;  %v40_v0 = vld [vmem:[#allocation2] sm:$0xff]  ;;  %v41_v1 = vld [vmem:[#allocation2 + $0x8] sm:$0xff]  ;;  %s212_s1 = smov [#allocation7]  }
  0x27   :  { %v42_v2 = vld [vmem:[#allocation5] sm:$0xff]  ;;  %v43_v3 = vld [vmem:[#allocation5 + $0x8] sm:$0xff]  ;;  %124 = vlog2.f32 %v40_v0  ;;  %v50_v4 = vsub.f32 1.0, %v40_v0  ;;  %v51_v5 = vsub.f32 1.0, %v41_v1  ;;  %s106_s6 = sshll.u32 %s212_s1, 4  ;;  %s107_s6 = int_to_ptr.vmem [resolvable:$true] %s106_s6 }
  0x28   :  { %126 = vlog2.f32 %v41_v1  ;;  %v98_v6 = vadd.f32 %v43_v3, %v42_v2  ;;  %v58_v15 = vsub.f32 1.0, %v42_v2  ;;  %v59_v18 = vsub.f32 1.0, %v43_v3  ;;  %s180_s7 = scalar_lea.vmem %s107_s6, 512  ;;  %p185_p3 = scmp.lt.s32.totalorder %s107_s6, %s107_s6 }
  0x29   :  { %128 = vlog2.f32 %v50_v4  ;;  %p181_p2 = scmp.ne.s32.totalorder %s107_s6, %s180_s7  ;;  %p186_p4 = scmp.lt.s32.totalorder %s180_s7, %s180_s7 }
  0x2a   :  { %130 = vlog2.f32 %v51_v5  ;;  %100 = vst [vmem:[#allocation7 + $0x18] sm:$0xff] %v98_v6 }
  0x2b   :  { %p187_p5 = por %p186_p4, %p185_p3 }
  0x2d   :  { %p188_p6 = pnand %p187_p5, %p181_p2 }
  0x31   :  { %v125_v7 = vpop.eup %124 }
  0x32   :  { %v127_v8 = vpop.eup %126  ;;  %v45_v9 = vmul.f32 0.6931472, %v125_v7 }
  0x33   :  { %v129_v10 = vpop.eup %128  ;;  %v47_v11 = vmul.f32 0.6931472, %v127_v8 }
  0x34   :  { %v131_v12 = vpop.eup %130  ;;  %v48_v13 = vmax.f32 %v45_v9, -100.0  ;;  %v53_v14 = vmul.f32 0.6931472, %v129_v10 }
  0x35   :  { %v49_v16 = vmax.f32 %v47_v11, -100.0  ;;  %v55_v17 = vmul.f32 0.6931472, %v131_v12 }
  0x36   :  { %v56_v19 = vmax.f32 %v53_v14, -100.0  ;;  %v60_v20 = vmul.f32 %v48_v13, %v42_v2 }
  0x37   :  { %v57_v21 = vmax.f32 %v55_v17, -100.0  ;;  %v61_v22 = vmul.f32 %v49_v16, %v43_v3 }
  0x38   :  { %v62_v23 = vmul.f32 %v58_v15, %v56_v19 }
  0x39   :  { %v63_v24 = vmul.f32 %v59_v18, %v57_v21 }
  0x3a   :  { %v64_v25 = vadd.f32 %v62_v23, %v60_v20 }
  0x3b   :  { %v65_v26 = vadd.f32 %v63_v24, %v61_v22 }
  0x3c   :  { %v66_v27 = vsub.f32 0.0, %v64_v25 }
  0x3d   :  { %v67_v28 = vsub.f32 0.0, %v65_v26 }
  0x3e   :  { %v68_v29 = vsub.f32 0.0, %v66_v27  ;;  %v78_v33 = vmul.f32 0.01, %v66_v27 }
  0x3f   :  { %v69_v30 = vsub.f32 0.0, %v67_v28  ;;  %v79_v34 = vmul.f32 0.01, %v67_v28 }
  0x40   :  { %v70_v31 = vmul.f32 1.442695, %v68_v29  ;;  %v80_v38 = vmul.f32 %v78_v33, %v42_v2  ;;  %v86_v39 = vmul.f32 %v78_v33, %v58_v15 }
  0x41   :  { %v72_v32 = vmul.f32 1.442695, %v69_v30  ;;  %v81_v42 = vmul.f32 %v79_v34, %v43_v3  ;;  %v87_v43 = vmul.f32 %v79_v34, %v59_v18 }
  0x42   :  { %132 = vpow2.f32 %v70_v31 }
  0x43   :  { %134 = vpow2.f32 %v72_v32 }
  0x4c   :  { %v133_v35 = vpop.eup %132 }
  0x4d   :  { %v135_v36 = vpop.eup %134  ;;  %v74_v37 = vsub.f32 1.0, %v133_v35 }
  0x4e   :  { %v90_v40 = vadd.f32 %v135_v36, %v133_v35  ;;  %v75_v41 = vsub.f32 1.0, %v135_v36 }
  0x4f   :  { %v76_v44 = vmul.f32 %v74_v37, %v74_v37 }
  0x50   :  { %91 = vst [vmem:[#allocation7] sm:$0xff] %v90_v40  ;;  %v77_v45 = vmul.f32 %v75_v41, %v75_v41 }
  0x51   :  { %v82_v46 = vmul.f32 %v80_v38, %v76_v44  ;;  %v88_v47 = vmul.f32 %v86_v39, %v76_v44 }
  0x52   :  { %v83_v48 = vmul.f32 %v81_v42, %v77_v45  ;;  %v89_v49 = vmul.f32 %v87_v43, %v77_v45 }
  0x53   :  { %v84_v50 = vmul.f32 %v82_v46, %v74_v37 }
  0x54   :  { %v85_v51 = vmul.f32 %v83_v48, %v75_v41  ;;  %v95_v52 = vadd.f32 %v89_v49, %v88_v47 }
  0x56   :  { %v92_v53 = vadd.f32 %v85_v51, %v84_v50  ;;  %97 = vst [vmem:[#allocation7 + $0x10] sm:$0xff] %v95_v52 }
  0x58   :  { %94 = vst [vmem:[#allocation7 + $0x8] sm:$0xff] %v92_v53 }
  0x59   :  { %191 = shalt.err (!%p188_p6)
}
  0x5a   :  { %s192_s10 = scalar_lea.hbm %s275_s2, 512 }
  0x5b   :  { %p193_p7 = scmp.ne.s32.totalorder %s275_s2, %s192_s10  ;;  %p196_p8 = scmp.lt.u32.totalorder %s192_s10, %s275_s2 }
  0x5d   :  { %p198_p9 = pnand %p196_p8, %p193_p7 }
  0x5f   :  { %201 = shalt.err (!%p198_p9)
}
  0x60   :  { %112 = dma.vmem_to_hbm [thread:$0]  %s107_s6, 512, %s275_s2, [#allocation4], %s209_s19, %s209_s19, %s210_s20  }
  0x61   :  { %206 = dma.done.wait [#allocation4], 512  }
  0x62   :  { %207 = vsyncadd [#allocation4], 4294966784 }
  0x63   :  { %116 = vsyncpa [#allocation3], 1 }
  0x64   :  { %117 = vsyncpa [#allocation6], 1 }
  0x65   :  { %118 = vsyncpa [#allocation4], 1 }

</bundles_post_ra>
